<compile_context>
chip_gen: v5e
topology: v5e:2x2
jax: 0.10.0
libtpu: 0.0.40
codegen_flags: <defaults>
</compile_context>

<pallas_src>
import functools

import jax
import jax.numpy as jnp
from jax.experimental import pallas as pl
from jax.experimental.pallas import tpu as pltpu

_LANE = 128
_NEG_BIG = -1e30  # finite "-inf": padded logits underflow to 0 in exp, no inf-inf NaN


def _attn_classifier_kernel(h_ref, w_ref, b_ref, o_ref):
    # h_ref: (1, B, H)   w_ref: (H, O_pad)   b_ref: (1, O_pad)   o_ref: (B, O_pad)
    x = h_ref[0]  # fused squeeze(0): (B, H)

    # Linear layer on the MXU: logits = x @ W^T + b (W stored pre-transposed).
    logits = jnp.dot(x, w_ref[...], preferred_element_type=jnp.float32) + b_ref[...]

    # Numerically stable log_softmax over dim=1 (class axis). Padded columns
    # carry bias -1e30 -> exp underflows to exactly 0, so they are inert.
    m = jnp.max(logits, axis=1, keepdims=True)
    shifted = logits - m
    lse = jnp.log(jnp.sum(jnp.exp(shifted), axis=1, keepdims=True))
    o_ref[...] = (shifted - lse).astype(o_ref.dtype)


def init_classifier_params(out_weight, out_bias):
    """One-time (model load / init) preparation of the nn.Linear(H, O) params.

    - Transposes (O, H) -> (H, O) so the in-kernel matmul needs no transpose.
    - Pads the class axis up to a multiple of 128 lanes for lane-dense vector
      ops / stores. Padded columns: weight 0, bias -1e30 (inert in logsumexp).
    Returns (w_t_padded (H, O_pad), b_padded (1, O_pad), output_size O).
    """
    O, H = out_weight.shape
    O_pad = ((O + _LANE - 1) // _LANE) * _LANE
    w_t = jnp.zeros((H, O_pad), out_weight.dtype).at[:, :O].set(out_weight.T)
    b = jnp.full((1, O_pad), _NEG_BIG, out_bias.dtype).at[0, :O].set(out_bias)
    return w_t, b, O


@functools.partial(jax.jit, static_argnames=("output_size",))
def attn_classifier_forward(encoder_hidden, encoder_outputs, attn_mask,
                            w_t_padded, b_padded, output_size):
    """Pallas equivalent of AttnClassifier.forward.

    encoder_hidden : (1, B, H) float32
    encoder_outputs: unused (API parity with the PyTorch module)
    attn_mask      : unused (API parity with the PyTorch module)
    w_t_padded     : (H, O_pad) float32, from init_classifier_params
    b_padded       : (1, O_pad) float32, from init_classifier_params
    output_size    : O (static)
    returns        : (B, O) float32 log-probabilities
    """
    del encoder_outputs, attn_mask  # not used in the reference forward pass

    _, B, _ = encoder_hidden.shape
    O_pad = w_t_padded.shape[1]

    vmem = pl.BlockSpec(memory_space=pltpu.MemorySpace.VMEM)
    out_padded = pl.pallas_call(
        _attn_classifier_kernel,
        out_shape=jax.ShapeDtypeStruct((B, O_pad), jnp.float32),
        in_specs=[vmem, vmem, vmem],
        out_specs=vmem,
    )(encoder_hidden, w_t_padded, b_padded)

    # Drop the lane-padding columns (tiny wrapper-side slice, fused under jit).
    return out_padded[:, :output_size]


if __name__ == "__main__":
    # Small shapes consistent with the module: seq-dim-1 hidden state,
    # batch=2, hidden_size=32, output_size=16, encoder seq len=8.
    B, H, O, S = 2, 32, 16, 8

    key = jax.random.PRNGKey(0)
    k_h, k_eo, k_w, k_b = jax.random.split(key, 4)

    encoder_hidden = jax.random.normal(k_h, (1, B, H), dtype=jnp.float32)
    encoder_outputs = jax.random.normal(k_eo, (S, B, H), dtype=jnp.float32)  # unused
    attn_mask = jnp.zeros((B, S), dtype=jnp.bool_)                           # unused

    # Deterministic init for self.out = nn.Linear(hidden_size, output_size).
    bound = 1.0 / jnp.sqrt(H)
    out_weight = jax.random.uniform(k_w, (O, H), jnp.float32, -bound, bound)
    out_bias = jax.random.uniform(k_b, (O,), jnp.float32, -bound, bound)

    # One-time init-time parameter prep (transpose + lane padding).
    w_t_padded, b_padded, out_size = init_classifier_params(out_weight, out_bias)

    result = attn_classifier_forward(encoder_hidden, encoder_outputs, attn_mask,
                                     w_t_padded, b_padded, out_size)
    jax.block_until_ready(result)

    # Pure-JAX reference (squeeze -> linear -> log_softmax over dim=1).
    ref = jax.nn.log_softmax(encoder_hidden[0] @ out_weight.T + out_bias, axis=1)
    assert result.shape == (B, O)
    assert jnp.allclose(result, ref, atol=1e-5, rtol=1e-5)

    print("KERNEL_OK")
</pallas_src>

<mosaic_0001>
module attributes {stable_mosaic.version = 11 : i64} {
  func.func @_attn_classifier_kernel(%arg0: memref<1x2x32xf32, #tpu.memory_space<vmem>>, %arg1: memref<32x128xf32, #tpu.memory_space<vmem>>, %arg2: memref<1x128xf32, #tpu.memory_space<vmem>>, %arg3: memref<2x128xf32, #tpu.memory_space<vmem>>) attributes {dimension_semantics = [], scalar_prefetch = 0 : i64, scratch_operands = 0 : i64, tpu.core_type = #tpu.core_type<tc>} {
    %c0 = arith.constant 0 : index
    %c0_0 = arith.constant 0 : index
    %c0_1 = arith.constant 0 : index
    %0 = vector.load %arg0[%c0, %c0_0, %c0_1] : memref<1x2x32xf32, #tpu.memory_space<vmem>>, vector<1x2x32xf32>
    %1 = vector.shape_cast %0 : vector<1x2x32xf32> to vector<2x32xf32>
    %c0_2 = arith.constant 0 : index
    %c0_3 = arith.constant 0 : index
    %2 = vector.load %arg1[%c0_2, %c0_3] : memref<32x128xf32, #tpu.memory_space<vmem>>, vector<32x128xf32>
    %cst = arith.constant dense<0.000000e+00> : vector<2x128xf32>
    %3 = tpu.matmul %1, %2, %cst {dimension_numbers = #tpu.dot_dimension_numbers<[1], [0], [0], [1], [0, 0, 1, 1], [], []>} : vector<2x32xf32>, vector<32x128xf32>, vector<2x128xf32> -> vector<2x128xf32>
    %c0_4 = arith.constant 0 : index
    %c0_5 = arith.constant 0 : index
    %4 = vector.load %arg2[%c0_4, %c0_5] : memref<1x128xf32, #tpu.memory_space<vmem>>, vector<1x128xf32>
    %5 = vector.broadcast %4 : vector<1x128xf32> to vector<2x128xf32>
    %6 = arith.addf %3, %5 : vector<2x128xf32>
    %cst_6 = arith.constant dense<0xFF800000> : vector<2xf32>
    %7 = vector.multi_reduction <maximumf>, %6, %cst_6 [1] : vector<2x128xf32> to vector<2xf32>
    %8 = vector.shape_cast %7 : vector<2xf32> to vector<2x1xf32>
    %9 = vector.broadcast %8 : vector<2x1xf32> to vector<2x128xf32>
    %10 = arith.subf %6, %9 : vector<2x128xf32>
    %11 = math.exp %10 : vector<2x128xf32>
    %cst_7 = arith.constant dense<0.000000e+00> : vector<2xf32>
    %12 = vector.multi_reduction <add>, %11, %cst_7 [1] : vector<2x128xf32> to vector<2xf32>
    %13 = vector.shape_cast %12 : vector<2xf32> to vector<2x1xf32>
    %14 = math.log %13 : vector<2x1xf32>
    %15 = vector.broadcast %14 : vector<2x1xf32> to vector<2x128xf32>
    %16 = arith.subf %10, %15 : vector<2x128xf32>
    %c0_8 = arith.constant 0 : index
    %c0_9 = arith.constant 0 : index
    %17 = vector.load %arg3[%c0_8, %c0_9] : memref<2x128xf32, #tpu.memory_space<vmem>>, vector<2x128xf32>
    tpu.vector_store %arg3[%c0_8, %c0_9], %16 {strides = array<i32>} : memref<2x128xf32, #tpu.memory_space<vmem>>, vector<2x128xf32>,
    return
  }
}

</mosaic_0001>

<bundles_post_ra>
// kernel: attn_classifier_forward.1
= control target key start
LH: loop header
LB: loop body
LE: loop exit
PB: predicated region body
PF: predicated region fallthrough
CT: control target
= control target key end

     0   :  { %8 = vsyncpa [#allocation3], 0  ;;  %s236_s0 = inlined_call_operand.hbm [shape: f32[1,2,32], index: 0, kind: input, shape index: {}]   ;;  %s237_s1 = inlined_call_operand.hbm [shape: f32[32,128], index: 1, kind: input, shape index: {}]   ;;  %s238_s2 = inlined_call_operand.vmem [shape: f32[1,128], index: 2, kind: input, shape index: {}]   ;;  %s239_s3 = inlined_call_operand.hbm [shape: f32[2,128], index: 3, kind: output, shape index: {}]  }
   0x1   :  { %9 = vsyncpa [#allocation6], 0 }
   0x2   :  { %10 = vsyncpa [#allocation4], 0  ;;  %s16_s14 = sshll.u32 %s236_s0, 4  ;;  %s199_s15 = smov [#allocation2]   ;;  %s17_s14 = int_to_ptr.hbm [resolvable:$true] %s16_s14 }
   0x3   :  { %s18_s16 = sshll.u32 %s199_s15, 4  ;;  %s26_s19 = sshll.u32 %s237_s1, 4  ;;  %s19_s16 = int_to_ptr.vmem [resolvable:$true] %s18_s16  ;;  %s27_s19 = int_to_ptr.hbm [resolvable:$true] %s26_s19 }
   0x4   :  { %21 = dma.hbm_to_vmem [thread:$0]  %s17_s14, 32, %s19_s16, [#allocation3]  }
   0x5   :  { %s200_s20 = smov [#allocation5]   ;;  %s201_s22 = smov 128  }
   0x6   :  { %s28_s21 = sshll.u32 %s200_s20, 4  ;;  %s202_s23 = smov 8   ;;  %s29_s21 = int_to_ptr.vmem [resolvable:$true] %s28_s21 }
   0x7   :  { %34 = dma.hbm_to_vmem [thread:$0]  %s27_s19, 512, %s29_s21, [#allocation6], %s201_s22, %s201_s22, %s202_s23  }
   0x8   :  { %193 = dma.done.wait [#allocation3], 32  }
   0x9   :  { %194 = vsyncadd [#allocation3], 4294967264 }
   0xa   :  { %195 = dma.done.wait [#allocation6], 512  }
   0xb   :  { %196 = vsyncadd [#allocation6], 4294966784  ;;  %v49_v0 = vld [vmem:[#allocation5 + $0x18] sm:$0xff]  ;;  %v48_v1 = vld [vmem:[#allocation5 + $0x10] sm:$0xff]  ;;  %vm54_vm0 = vcmask 261120   ;;  %vm78_vm1 = vcmask 1041408  }
   0xc   :  { %70 = vmatpush.msra.mxu0 %v49_v0  ;;  %v47_v2 = vld [vmem:[#allocation5 + $0x8] sm:$0xff]  ;;  %v46_v3 = vld [vmem:[#allocation5] sm:$0xff]  ;;  %v45_v4 = vld [vmem:[#allocation2] sm:$0x3]  ;;  %s203_s24 = smov [#allocation7]  }
   0xd   :  { %v116_v5 = vld [vmem:[%s238_s2] ss:$0 sm:$0xff]  ;;  %s97_s25 = sshll.u32 %s203_s24, 4  ;;  %s99_s2 = sshll.u32 %s239_s3, 4  ;;  %s98_s25 = int_to_ptr.vmem [resolvable:$true] %s97_s25  ;;  %s100_s2 = int_to_ptr.hbm [resolvable:$true] %s99_s2 }
   0xe   :  { %71 = vmatpush.msra.mxu0 %v48_v1 }
  0x10   :  { %72 = vmatpush.msra.mxu0 %v47_v2 }
  0x12   :  { %73 = vmatpush.msra.mxu0 %v46_v3 }
  0x13   :  { %110 = vmatmul.msk.f32.vlgmr.msra.gmra.mxu0 %vm54_vm0, %v45_v4 }
  0x90   :  { %v75_v6 = vpop.f32.mrf.mxu0 }
  0x91   :  { %v76_v7 = vadd.f32 %v116_v5, %v75_v6 }
  0x93   :  { %v79_v8 = vsel %vm78_vm1, %v76_v7, -inf }
  0x94   :  { %80 = vmax.xlane.f32.xlu0 %v79_v8 }
 0x107   :  { %v81_v9 = vpop.xlane.xlu0 %80 }
 0x108   :  { %v82_v10 = vsub.f32 %v76_v7, %v81_v9 }
 0x10a   :  { %v83_v11 = vmul.f32 1.442695, %v82_v10 }
 0x10c   :  { %117 = vpow2.f32 %v83_v11 }
 0x112   :  { %v118_v12 = vpop.eup %117 }
 0x113   :  { %v85_v13 = vsel %vm78_vm1, %v118_v12, 0.0 }
 0x114   :  { %86 = vadd.xlane.f32.xlu0 %v85_v13 }
 0x187   :  { %v87_v14 = vpop.xlane.xlu0 %86 }
 0x188   :  { %119 = vlog2.f32 %v87_v14 }
 0x18e   :  { %v120_v15 = vpop.eup %119 }
 0x18f   :  { %v89_v16 = vmul.f32 0.6931472, %v120_v15 }
 0x191   :  { %v90_v17 = vsub.f32 %v82_v10, %v89_v16 }
 0x193   :  { %91 = vst [vmem:[#allocation7] sm:$0x3] %v90_v17 }
 0x194   :  { %102 = dma.vmem_to_hbm [thread:$0]  %s98_s25, 32, %s100_s2, [#allocation4]  }
 0x195   :  { %197 = dma.done.wait [#allocation4], 32  }
 0x196   :  { %198 = vsyncadd [#allocation4], 4294967264 }
 0x197   :  { %107 = vsyncpa [#allocation3], 1 }
 0x198   :  { %108 = vsyncpa [#allocation6], 1 }
 0x199   :  { %109 = vsyncpa [#allocation4], 1 }

</bundles_post_ra>
